<compile_context>
chip_gen: v6e
topology: v6e:2x2x1
jax: 0.10.0
libtpu: 0.0.40
codegen_flags: <defaults>
</compile_context>

<pallas_src>
import jax
import jax.numpy as jnp
from jax.experimental import pallas as pl
from jax.experimental.pallas import tpu as pltpu

N_BITS = 8
N_LEVELS = 2 ** N_BITS          # asymmetric quantizer (sym=False)

_LANE = 128
_WIDE = 2048                    # lane-dense row width (multiple of 128)
_TARGET_BLOCK_BYTES = 4 * 1024 * 1024   # ~4 MiB blocks (f32)
_VMEM_LIMIT_BYTES = 32 * 1024 * 1024    # safe on v5e/v6e (128 MiB) and v7x (64 MiB)


# ----------------------------- Pallas kernels ------------------------------

def _minmax_kernel(x_ref, min_ref, max_ref, accmin_ref, accmax_ref):
    """Tensor-wide min/max.

    Per grid step: elementwise/sublane reduce into a (1, WIDE) VMEM
    accumulator (VPU-friendly).  The cross-lane reduce to a (1, 1) scalar
    happens once, on the last step.
    """
    @pl.when(pl.program_id(0) == 0)
    def _():
        accmin_ref[...] = jnp.full_like(accmin_ref, jnp.inf)
        accmax_ref[...] = jnp.full_like(accmax_ref, -jnp.inf)

    x = x_ref[...].astype(jnp.float32)
    accmin_ref[...] = jnp.minimum(accmin_ref[...],
                                  jnp.min(x, axis=0, keepdims=True))
    accmax_ref[...] = jnp.maximum(accmax_ref[...],
                                  jnp.max(x, axis=0, keepdims=True))

    @pl.when(pl.program_id(0) == pl.num_programs(0) - 1)
    def _():
        min_ref[...] = jnp.min(accmin_ref[...], keepdims=True)
        max_ref[...] = jnp.max(accmax_ref[...], keepdims=True)


def _quant_dequant_kernel(params_ref, x_ref, o_ref):
    """x -> (clamp(round(x*inv_delta)+zp, 0, n_levels-1) - zp) * delta.

    params_ref (SMEM, f32[3]) = [inv_delta, delta, zero_point].
    round_ste == plain round in the forward pass (STE only affects backward).
    """
    inv_delta = params_ref[0]
    delta = params_ref[1]
    zp = params_ref[2]
    x = x_ref[...].astype(jnp.float32)
    x_quant = jnp.clip(jnp.round(x * inv_delta) + zp, 0.0, float(N_LEVELS - 1))
    o_ref[...] = ((x_quant - zp) * delta).astype(o_ref.dtype)


# ----------------------------- layout helpers -------------------------------

def _choose_layout(total_elems: int):
    """Pick (wide, rows, block_rows) for a lane-dense 2D view of the tensor."""
    wide = _WIDE
    if total_elems < wide:
        wide = max(_LANE, pl.cdiv(total_elems, _LANE) * _LANE)
    rows = pl.cdiv(total_elems, wide)
    target_rows = max(8, _TARGET_BLOCK_BYTES // (wide * 4))
    if rows <= target_rows:
        block_rows = rows                    # full-extent block (no (8,128) rule)
    else:
        block_rows = (target_rows // 8) * 8  # multiple of 8 sublanes
        rows = pl.cdiv(rows, block_rows) * block_rows
    return wide, rows, block_rows


def _as_2d(x: jax.Array, wide: int, rows: int) -> jax.Array:
    """Flatten + edge-pad to (rows, wide).  Edge padding repeats the last
    element, so it never perturbs the min/max reduction."""
    x_flat = x.reshape(-1)
    pad = rows * wide - x_flat.shape[0]
    if pad:
        x_flat = jnp.pad(x_flat, (0, pad), mode='edge')
    return x_flat.reshape(rows, wide)


# ----------------------------- pallas_call wrappers --------------------------

def _tensor_minmax(x2d: jax.Array, block_rows: int):
    R, C = x2d.shape
    mn, mx = pl.pallas_call(
        _minmax_kernel,
        out_shape=(jax.ShapeDtypeStruct((1, 1), jnp.float32),
                   jax.ShapeDtypeStruct((1, 1), jnp.float32)),
        grid=(R // block_rows,),
        in_specs=[pl.BlockSpec((block_rows, C), lambda i: (i, 0))],
        out_specs=(pl.BlockSpec((1, 1), lambda i: (0, 0)),
                   pl.BlockSpec((1, 1), lambda i: (0, 0))),
        scratch_shapes=[pltpu.VMEM((1, C), jnp.float32),
                        pltpu.VMEM((1, C), jnp.float32)],
        compiler_params=pltpu.CompilerParams(
            dimension_semantics=("arbitrary",),      # true reduction axis
            vmem_limit_bytes=_VMEM_LIMIT_BYTES),
    )(x2d)
    return mn[0, 0], mx[0, 0]


def _quant_dequant(x2d: jax.Array, params: jax.Array,
                   block_rows: int) -> jax.Array:
    R, C = x2d.shape
    return pl.pallas_call(
        _quant_dequant_kernel,
        out_shape=jax.ShapeDtypeStruct((R, C), x2d.dtype),
        grid=(R // block_rows,),
        in_specs=[
            pl.BlockSpec(memory_space=pltpu.MemorySpace.SMEM),  # [inv_d, d, zp]
            pl.BlockSpec((block_rows, C), lambda i: (i, 0)),
        ],
        out_specs=pl.BlockSpec((block_rows, C), lambda i: (i, 0)),
        compiler_params=pltpu.CompilerParams(
            dimension_semantics=("parallel",),   # no cross-step dependency;
            vmem_limit_bytes=_VMEM_LIMIT_BYTES), # shards across v7x's 2 TCs
    )(params, x2d)


# ----------------------------- module port ----------------------------------

class UniformAffineQuantizerPallas:
    """JAX/Pallas port of UniformAffineQuantizer (forward pass)."""

    def __init__(self, n_bits: int = 8, symmetric: bool = False,
                 channel_wise: bool = False, scale_method: str = 'max',
                 leaf_param: bool = False, always_zero: bool = False):
        assert 2 <= n_bits <= 8, 'bitwidth not supported'
        assert n_bits == N_BITS, 'kernel compiled for n_bits=8'
        assert not symmetric and not channel_wise and scale_method == 'max' \
            and not leaf_param, \
            'only the default (asym, tensor-wise, max) config is implemented'
        # TODO(synk): channel_wise / 'mse' scale-search / leaf_param EMA
        # calibration branches (host-side init logic) are not implemented.
        self.sym = symmetric
        self.n_bits = n_bits
        self.n_levels = 2 ** n_bits
        self.always_zero = always_zero
        self.delta = None
        self.zero_point = None
        self.params = None       # f32[3] = [inv_delta, delta, zero_point]
        self.inited = False

    def _init_scale(self, x2d: jax.Array, block_rows: int):
        mn, mx = _tensor_minmax(x2d, block_rows)      # f32 scalars (on device)
        # PyTorch 'max' path: delta from raw (max - min); zero_point from
        # x_min clamped to <= 0; delta clamped to >= 1e-8 BEFORE the zp round.
        x_min = jnp.minimum(mn, 0.0)
        delta = (mx - mn) / jnp.float32(self.n_levels - 1)
        delta = jnp.maximum(delta, jnp.float32(1e-8))
        if self.sym or self.always_zero:
            zero_point = jnp.float32(0.0)
        else:
            zero_point = jnp.round(-x_min / delta)    # half-even, like round()
        inv_delta = jnp.float32(1.0) / delta
        self.delta = delta
        self.zero_point = zero_point
        self.params = jnp.stack([inv_delta, delta, zero_point]).astype(jnp.float32)
        self.inited = True
        # TODO(synk): stateful `inited` flag means the first call is not
        # jit-traceable; split calibration/apply for a functional API.

    def __call__(self, x: jax.Array) -> jax.Array:
        orig_shape = x.shape
        total = x.size
        wide, rows, block_rows = _choose_layout(total)
        x2d = _as_2d(x, wide, rows)

        if not self.inited:
            self._init_scale(x2d, block_rows)

        out2d = _quant_dequant(x2d, self.params, block_rows)
        return out2d.reshape(-1)[:total].reshape(orig_shape)


if __name__ == "__main__":
    key = jax.random.PRNGKey(0)
    x = jax.random.normal(key, (2, 4, 16, 16), dtype=jnp.float32)

    quantizer = UniformAffineQuantizerPallas(n_bits=8)
    y = quantizer(x)
    y = jax.block_until_ready(y)

    # sanity check against a plain-JAX reference of the same math
    inv_delta, delta, zp = (quantizer.params[0], quantizer.params[1],
                            quantizer.params[2])
    ref = (jnp.clip(jnp.round(x * inv_delta) + zp, 0.0, N_LEVELS - 1) - zp) * delta

    assert y.shape == x.shape and y.dtype == x.dtype
    assert jnp.allclose(y, ref, atol=1e-5), "mismatch vs reference"
    # scale/zero-point sanity (range of normal(0,1) over 2048 samples)
    assert float(quantizer.delta) > 0.0 and float(quantizer.zero_point) >= 0.0

    print("KERNEL_OK")
</pallas_src>

<mosaic_0001>
module attributes {stable_mosaic.version = 11 : i64} {
  func.func @_minmax_kernel(%arg0: i32, %arg1: memref<1x2048xf32, #tpu.memory_space<vmem>>, %arg2: memref<1x1xf32, #tpu.memory_space<vmem>>, %arg3: memref<1x1xf32, #tpu.memory_space<vmem>>, %arg4: memref<1x2048xf32, #tpu.memory_space<vmem>>, %arg5: memref<1x2048xf32, #tpu.memory_space<vmem>>) attributes {dimension_semantics = [#tpu.dimension_semantics<arbitrary>], iteration_bounds = array<i64: 1>, scalar_prefetch = 0 : i64, scratch_operands = 2 : i64, tpu.core_type = #tpu.core_type<tc>, window_params = [{transform_indices = @transform_0, window_bounds = array<i64: 1, 2048>}, {pipeline_mode = #tpu.pipeline_mode<synchronous>, transform_indices = @transform_1, window_bounds = array<i64: 1, 1>}, {pipeline_mode = #tpu.pipeline_mode<synchronous>, transform_indices = @transform_2, window_bounds = array<i64: 1, 1>}]} {
    %c0_i32 = arith.constant 0 : i32
    %0 = arith.cmpi eq, %arg0, %c0_i32 : i32
    %1 = arith.extui %0 : i1 to i32
    %c0_i32_0 = arith.constant 0 : i32
    %2 = arith.cmpi ne, %1, %c0_i32_0 : i32
    scf.if %2 {
      %cst_13 = arith.constant 0x7F800000 : f32
      %17 = vector.broadcast %cst_13 : f32 to vector<1x2048xf32>
      %c0_14 = arith.constant 0 : index
      %c0_15 = arith.constant 0 : index
      %18 = vector.load %arg4[%c0_14, %c0_15] : memref<1x2048xf32, #tpu.memory_space<vmem>>, vector<1x2048xf32>
      tpu.vector_store %arg4[%c0_14, %c0_15], %17 {strides = array<i32>} : memref<1x2048xf32, #tpu.memory_space<vmem>>, vector<1x2048xf32>,
      %cst_16 = arith.constant 0xFF800000 : f32
      %19 = vector.broadcast %cst_16 : f32 to vector<1x2048xf32>
      %c0_17 = arith.constant 0 : index
      %c0_18 = arith.constant 0 : index
      %20 = vector.load %arg5[%c0_17, %c0_18] : memref<1x2048xf32, #tpu.memory_space<vmem>>, vector<1x2048xf32>
      tpu.vector_store %arg5[%c0_17, %c0_18], %19 {strides = array<i32>} : memref<1x2048xf32, #tpu.memory_space<vmem>>, vector<1x2048xf32>,
    } else {
    }
    %c0 = arith.constant 0 : index
    %c0_1 = arith.constant 0 : index
    %3 = vector.load %arg1[%c0, %c0_1] : memref<1x2048xf32, #tpu.memory_space<vmem>>, vector<1x2048xf32>
    %c0_2 = arith.constant 0 : index
    %c0_3 = arith.constant 0 : index
    %4 = vector.load %arg4[%c0_2, %c0_3] : memref<1x2048xf32, #tpu.memory_space<vmem>>, vector<1x2048xf32>
    %cst = arith.constant dense<0x7F800000> : vector<2048xf32>
    %5 = vector.multi_reduction <minimumf>, %3, %cst [0] : vector<1x2048xf32> to vector<2048xf32>
    %6 = vector.shape_cast %5 : vector<2048xf32> to vector<1x2048xf32>
    %7 = arith.minimumf %4, %6 : vector<1x2048xf32>
    %c0_4 = arith.constant 0 : index
    %c0_5 = arith.constant 0 : index
    %8 = vector.load %arg4[%c0_4, %c0_5] : memref<1x2048xf32, #tpu.memory_space<vmem>>, vector<1x2048xf32>
    tpu.vector_store %arg4[%c0_4, %c0_5], %7 {strides = array<i32>} : memref<1x2048xf32, #tpu.memory_space<vmem>>, vector<1x2048xf32>,
    %c0_6 = arith.constant 0 : index
    %c0_7 = arith.constant 0 : index
    %9 = vector.load %arg5[%c0_6, %c0_7] : memref<1x2048xf32, #tpu.memory_space<vmem>>, vector<1x2048xf32>
    %cst_8 = arith.constant dense<0xFF800000> : vector<2048xf32>
    %10 = vector.multi_reduction <maximumf>, %3, %cst_8 [0] : vector<1x2048xf32> to vector<2048xf32>
    %11 = vector.shape_cast %10 : vector<2048xf32> to vector<1x2048xf32>
    %12 = arith.maximumf %9, %11 : vector<1x2048xf32>
    %c0_9 = arith.constant 0 : index
    %c0_10 = arith.constant 0 : index
    %13 = vector.load %arg5[%c0_9, %c0_10] : memref<1x2048xf32, #tpu.memory_space<vmem>>, vector<1x2048xf32>
    tpu.vector_store %arg5[%c0_9, %c0_10], %12 {strides = array<i32>} : memref<1x2048xf32, #tpu.memory_space<vmem>>, vector<1x2048xf32>,
    %c0_i32_11 = arith.constant 0 : i32
    %14 = arith.cmpi eq, %arg0, %c0_i32_11 : i32
    %15 = arith.extui %14 : i1 to i32
    %c0_i32_12 = arith.constant 0 : i32
    %16 = arith.cmpi ne, %15, %c0_i32_12 : i32
    scf.if %16 {
      %c0_13 = arith.constant 0 : index
      %c0_14 = arith.constant 0 : index
      %17 = vector.load %arg4[%c0_13, %c0_14] : memref<1x2048xf32, #tpu.memory_space<vmem>>, vector<1x2048xf32>
      %18 = vector.shape_cast %17 : vector<1x2048xf32> to vector<1x1x2048xf32>
      %cst_15 = arith.constant dense<0x7F800000> : vector<1xf32>
      %19 = vector.multi_reduction <minimumf>, %18, %cst_15 [1, 2] : vector<1x1x2048xf32> to vector<1xf32>
      %20 = vector.shape_cast %19 : vector<1xf32> to vector<1x1x1xf32>
      %21 = vector.extract %20[0, 0, 0] : f32 from vector<1x1x1xf32>
      %22 = vector.broadcast %21 : f32 to vector<1x1xf32>
      %c0_16 = arith.constant 0 : index
      %c0_17 = arith.constant 0 : index
      %23 = vector.load %arg2[%c0_16, %c0_17] : memref<1x1xf32, #tpu.memory_space<vmem>>, vector<1x1xf32>
      tpu.vector_store %arg2[%c0_16, %c0_17], %22 {strides = array<i32>} : memref<1x1xf32, #tpu.memory_space<vmem>>, vector<1x1xf32>,
      %c0_18 = arith.constant 0 : index
      %c0_19 = arith.constant 0 : index
      %24 = vector.load %arg5[%c0_18, %c0_19] : memref<1x2048xf32, #tpu.memory_space<vmem>>, vector<1x2048xf32>
      %25 = vector.shape_cast %24 : vector<1x2048xf32> to vector<1x1x2048xf32>
      %cst_20 = arith.constant dense<0xFF800000> : vector<1xf32>
      %26 = vector.multi_reduction <maximumf>, %25, %cst_20 [1, 2] : vector<1x1x2048xf32> to vector<1xf32>
      %27 = vector.shape_cast %26 : vector<1xf32> to vector<1x1x1xf32>
      %28 = vector.extract %27[0, 0, 0] : f32 from vector<1x1x1xf32>
      %29 = vector.broadcast %28 : f32 to vector<1x1xf32>
      %c0_21 = arith.constant 0 : index
      %c0_22 = arith.constant 0 : index
      %30 = vector.load %arg3[%c0_21, %c0_22] : memref<1x1xf32, #tpu.memory_space<vmem>>, vector<1x1xf32>
      tpu.vector_store %arg3[%c0_21, %c0_22], %29 {strides = array<i32>} : memref<1x1xf32, #tpu.memory_space<vmem>>, vector<1x1xf32>,
    } else {
    }
    return
  }
  func.func @transform_0(%arg0: i32) -> (i32, i32) {
    %c0_i32 = arith.constant 0 : i32
    %c0_i32_0 = arith.constant 0 : i32
    return %arg0, %c0_i32 : i32, i32
  }
  func.func @transform_1(%arg0: i32) -> (i32, i32) {
    %c0_i32 = arith.constant 0 : i32
    %c0_i32_0 = arith.constant 0 : i32
    %c0_i32_1 = arith.constant 0 : i32
    return %c0_i32, %c0_i32_0 : i32, i32
  }
  func.func @transform_2(%arg0: i32) -> (i32, i32) {
    %c0_i32 = arith.constant 0 : i32
    %c0_i32_0 = arith.constant 0 : i32
    %c0_i32_1 = arith.constant 0 : i32
    return %c0_i32, %c0_i32_0 : i32, i32
  }
}

</mosaic_0001>

<bundles_post_ra>
// kernel: tpu_custom_call.1
= control target key start
LH: loop header
LB: loop body
LE: loop exit
PB: predicated region body
PF: predicated region fallthrough
CT: control target
= control target key end

     0   :  { %8 = vsyncpa [#allocation5], 0  ;;  %s466_s0 = inlined_call_operand.hbm [shape: f32[1,2048], index: 0, kind: input, shape index: {}]   ;;  %s467_s1 = inlined_call_operand.hbm [shape: f32[1,1], index: 1, kind: output, shape index: {0}]   ;;  %s468_s2 = inlined_call_operand.hbm [shape: f32[1,1], index: 2, kind: output, shape index: {1}]  }
   0x1   :  { %9 = vsyncpa [#allocation6], 0 }
   0x2   :  { %10 = vsyncpa [#allocation9], 0  ;;  %s405_s9 = smov [#allocation4]  }
   0x3   :  { %s17_s10 = sshll.u32 %s405_s9, 4  ;;  %s18_s10 = int_to_ptr.vmem [resolvable:$true] %s17_s10 }
   0x4   :  { %s347_s11 = scalar_lea.vmem %s18_s10, 256  ;;  %p352_p1 = scmp.lt.s32.totalorder %s18_s10, %s18_s10 }
   0x5   :  { %p348_p0 = scmp.ne.s32.totalorder %s18_s10, %s347_s11  ;;  %p353_p2 = scmp.lt.s32.totalorder %s347_s11, %s347_s11 }
   0x7   :  { %p354_p3 = por %p353_p2, %p352_p1 }
   0x9   :  { %p355_p4 = pnand %p354_p3, %p348_p0 }
   0xb   :  { %358 = shalt.err (!%p355_p4)
}
   0xc   :  { %20 = dma.hbm_to_vmem [thread:$0]  %s466_s0, 256, %s18_s10, [#allocation5]  }
   0xd   :  { %399 = dma.done.wait [#allocation5], 256  }
   0xe   :  { %400 = vsyncadd [#allocation5], 4294967040  ;;  %v53_v0 = vlaneseq  ;;  %v32_v10 = vld [vmem:[#allocation4] sm:$0xff]  ;;  %v33_v11 = vld [vmem:[#allocation4 + $0x8] sm:$0xff]  ;;  %vm133_vm0 = vcmask 1040384   ;;  %s406_s0 = smov [#allocation7]  }
   0xf   :  { %s309_s14 = sshll.u32 %s406_s0, 4  ;;  %vm175_vm1 = vcmask 0   ;;  %s310_s14 = int_to_ptr.vmem [resolvable:$true] %s309_s14 }
  0x10   :  { %v54_v1 = vshrl.u32 %v53_v0, 7  ;;  %s359_s16 = scalar_lea.vmem %s310_s14, 16  ;;  %s363_s17 = scalar_lea.vmem %s310_s14, 32 }
  0x11   :  { %p360_p5 = scmp.ne.s32.totalorder %s310_s14, %s359_s16  ;;  %p364_p6 = scmp.lt.s32.totalorder %s310_s14, %s310_s14 }
  0x12   :  { %v55_v2 = vsub.s32 0, %v54_v1  ;;  %v59_v3 = vsub.s32 1, %v54_v1  ;;  %v63_v4 = vsub.s32 2, %v54_v1  ;;  %v67_v5 = vsub.s32 3, %v54_v1  ;;  %p365_p7 = scmp.lt.s32.totalorder %s363_s17, %s359_s16 }
  0x13   :  { %v71_v6 = vsub.s32 4, %v54_v1  ;;  %v75_v7 = vsub.s32 5, %v54_v1  ;;  %v79_v8 = vsub.s32 6, %v54_v1  ;;  %v83_v9 = vsub.s32 7, %v54_v1 }
  0x14   :  { %v56_v12 = vrot.slane %v32_v10, %v55_v2  ;;  %v60_v13 = vrot.slane %v32_v10, %v59_v3  ;;  %v64_v14 = vrot.slane %v32_v10, %v63_v4  ;;  %v68_v15 = vrot.slane %v32_v10, %v67_v5  ;;  %p366_p8 = por %p365_p7, %p364_p6 }
  0x15   :  { %v72_v16 = vrot.slane %v32_v10, %v71_v6  ;;  %v76_v17 = vrot.slane %v32_v10, %v75_v7  ;;  %v80_v18 = vrot.slane %v32_v10, %v79_v8  ;;  %v84_v19 = vrot.slane %v32_v10, %v83_v9 }
  0x16   :  { %v88_v20 = vrot.slane %v33_v11, %v55_v2  ;;  %v92_v21 = vrot.slane %v33_v11, %v59_v3  ;;  %v96_v22 = vrot.slane %v33_v11, %v63_v4  ;;  %v100_v23 = vrot.slane %v33_v11, %v67_v5  ;;  %p367_p9 = pnand %p366_p8, %p360_p5 }
  0x17   :  { %v104_v24 = vrot.slane %v33_v11, %v71_v6  ;;  %v108_v25 = vrot.slane %v33_v11, %v75_v7  ;;  %v112_v26 = vrot.slane %v33_v11, %v79_v8  ;;  %v116_v27 = vrot.slane %v33_v11, %v83_v9 }
  0x18   :  { %v134_v28 = vsel %vm133_vm0, %v56_v12, inf  ;;  %v135_v29 = vsel %vm133_vm0, %v60_v13, inf  ;;  %v136_v30 = vsel %vm133_vm0, %v64_v14, inf  ;;  %v137_v31 = vsel %vm133_vm0, %v68_v15, inf }
  0x19   :  { %v138_v32 = vsel %vm133_vm0, %v72_v16, inf  ;;  %v140_v33 = vsel %vm133_vm0, %v76_v17, inf  ;;  %v142_v34 = vsel %vm133_vm0, %v80_v18, inf  ;;  %v144_v35 = vsel %vm133_vm0, %v84_v19, inf }
  0x1a   :  { %v139_v36 = vmin.f32 %v134_v28, %v138_v32  ;;  %v141_v37 = vmin.f32 %v135_v29, %v140_v33  ;;  %v143_v38 = vmin.f32 %v136_v30, %v142_v34  ;;  %v145_v39 = vmin.f32 %v137_v31, %v144_v35 }
  0x1b   :  { %v146_v40 = vsel %vm133_vm0, %v88_v20, inf  ;;  %v148_v41 = vsel %vm133_vm0, %v92_v21, inf  ;;  %v150_v42 = vsel %vm133_vm0, %v96_v22, inf  ;;  %v152_v43 = vsel %vm133_vm0, %v100_v23, inf }
  0x1c   :  { %v147_v44 = vmin.f32 %v139_v36, %v146_v40  ;;  %v149_v45 = vmin.f32 %v141_v37, %v148_v41  ;;  %v151_v46 = vmin.f32 %v143_v38, %v150_v42  ;;  %v153_v47 = vmin.f32 %v145_v39, %v152_v43 }
  0x1d   :  { %v154_v48 = vsel %vm133_vm0, %v104_v24, inf  ;;  %v156_v49 = vsel %vm133_vm0, %v108_v25, inf  ;;  %v158_v50 = vsel %vm133_vm0, %v112_v26, inf  ;;  %v160_v51 = vsel %vm133_vm0, %v116_v27, inf }
  0x1e   :  { %v155_v52 = vmin.f32 %v147_v44, %v154_v48  ;;  %v157_v53 = vmin.f32 %v149_v45, %v156_v49  ;;  %v159_v54 = vmin.f32 %v151_v46, %v158_v50  ;;  %v161_v55 = vmin.f32 %v153_v47, %v160_v51 }
  0x1f   :  { %v261_v56 = vsel %vm133_vm0, %v56_v12, -inf  ;;  %v262_v57 = vsel %vm133_vm0, %v60_v13, -inf  ;;  %v263_v58 = vsel %vm133_vm0, %v64_v14, -inf  ;;  %v264_v59 = vsel %vm133_vm0, %v68_v15, -inf }
  0x20   :  { %v162_v60 = vmin.f32 %v155_v52, %v157_v53  ;;  %v163_v61 = vmin.f32 %v159_v54, %v161_v55  ;;  %v265_v62 = vsel %vm133_vm0, %v72_v16, -inf  ;;  %v267_v63 = vsel %vm133_vm0, %v76_v17, -inf }
  0x21   :  { %v266_v0 = vmax.f32 %v261_v56, %v265_v62  ;;  %v268_v1 = vmax.f32 %v262_v57, %v267_v63  ;;  %v269_v2 = vsel %vm133_vm0, %v80_v18, -inf  ;;  %v271_v3 = vsel %vm133_vm0, %v84_v19, -inf }
  0x22   :  { %v164_v4 = vmin.f32 %v162_v60, %v163_v61  ;;  %v270_v5 = vmax.f32 %v263_v58, %v269_v2  ;;  %v272_v6 = vmax.f32 %v264_v59, %v271_v3  ;;  %v273_v7 = vsel %vm133_vm0, %v88_v20, -inf }
  0x23   :  { %v274_v8 = vmax.f32 %v266_v0, %v273_v7  ;;  %v275_v9 = vsel %vm133_vm0, %v92_v21, -inf  ;;  %v277_v10 = vsel %vm133_vm0, %v96_v22, -inf  ;;  %v279_v11 = vsel %vm133_vm0, %v100_v23, -inf }
  0x24   :  { %165 = vmin.xlane.f32.xlu0 %v164_v4  ;;  %v276_v12 = vmax.f32 %v268_v1, %v275_v9  ;;  %v278_v13 = vmax.f32 %v270_v5, %v277_v10  ;;  %v280_v14 = vmax.f32 %v272_v6, %v279_v11  ;;  %v281_v15 = vsel %vm133_vm0, %v104_v24, -inf }
  0x25   :  { %v282_v16 = vmax.f32 %v274_v8, %v281_v15  ;;  %v283_v17 = vsel %vm133_vm0, %v108_v25, -inf  ;;  %v285_v18 = vsel %vm133_vm0, %v112_v26, -inf  ;;  %v287_v19 = vsel %vm133_vm0, %v116_v27, -inf }
  0x26   :  { %v284_v20 = vmax.f32 %v276_v12, %v283_v17  ;;  %v286_v28 = vmax.f32 %v278_v13, %v285_v18  ;;  %v288_v21 = vmax.f32 %v280_v14, %v287_v19 }
  0x28   :  { %v289_v29 = vmax.f32 %v282_v16, %v284_v20  ;;  %v290_v22 = vmax.f32 %v286_v28, %v288_v21 }
  0x2a   :  { %v291_v30 = vmax.f32 %v289_v29, %v290_v22 }
  0x2c   :  { %292 = vmax.xlane.f32.xlu0 %v291_v30 }
  0xad   :  { %v166_v23 = vpop.xlane.xlu0 %165 }
  0xae   :  { %v167_v31 = vrot.slane %v166_v23, 4 }
  0xb0   :  { %v168_v32 = vmin.f32 %v166_v23, %v167_v31 }
  0xb2   :  { %v169_v33 = vrot.slane %v168_v32, 2 }
  0xb4   :  { %v170_v34 = vmin.f32 %v168_v32, %v169_v33 }
  0xb5   :  { %v293_v24 = vpop.xlane.xlu0 %292 }
  0xb6   :  { %v294_v35 = vrot.slane %v293_v24, 4  ;;  %v171_v36 = vrot.slane %v170_v34, 1 }
  0xb8   :  { %v295_v25 = vmax.f32 %v293_v24, %v294_v35  ;;  %v172_v37 = vmin.f32 %v170_v34, %v171_v36 }
  0xba   :  { %v296_v26 = vrot.slane %v295_v25, 2  ;;  %332 = vpush %v172_v37 }
  0xbc   :  { %v297_v27 = vmax.f32 %v295_v25, %v296_v26 }
  0xbe   :  { %v298_v38 = vrot.slane %v297_v27, 1 }
  0xc0   :  { %v299_v39 = vmax.f32 %v297_v27, %v298_v38 }
  0xc2   :  { %334 = vpush %v299_v39 }
  0xeb   :  { %s333_s15 = spop %332 }
  0xec   :  { %v174_v40 = vstv %s333_s15 }
  0xed   :  { %176 = vst.msk [vmem:[#allocation7] sm:$0x1] %vm175_vm1, %v174_v40 }
  0xee   :  { %370 = shalt.err (!%p367_p9)
}
  0xef   :  { %312 = dma.vmem_to_hbm [thread:$0]  %s310_s14, 16, %s467_s1, [#allocation6]  }
  0xf0   :  { %s407_s20 = smov [#allocation8]  }
  0xf1   :  { %s319_s21 = sshll.u32 %s407_s20, 4  ;;  %s320_s21 = int_to_ptr.vmem [resolvable:$true] %s319_s21 }
  0xf2   :  { %s379_s23 = scalar_lea.vmem %s320_s21, 16  ;;  %s383_s24 = scalar_lea.vmem %s320_s21, 32 }
  0xf3   :  { %s335_s22 = spop %334  ;;  %p380_p10 = scmp.ne.s32.totalorder %s320_s21, %s379_s23 }
  0xf4   :  { %v301_v41 = vstv %s335_s22  ;;  %p384_p11 = scmp.lt.s32.totalorder %s320_s21, %s320_s21  ;;  %p385_p12 = scmp.lt.s32.totalorder %s383_s24, %s379_s23 }
  0xf5   :  { %302 = vst.msk [vmem:[#allocation8] sm:$0x1] %vm175_vm1, %v301_v41 }
  0xf6   :  { %p386_p13 = por %p385_p12, %p384_p11 }
  0xf8   :  { %p387_p0 = pnand %p386_p13, %p380_p10 }
  0xfa   :  { %390 = shalt.err (!%p387_p0)
}
  0xfb   :  { %322 = dma.vmem_to_hbm [thread:$0]  %s320_s21, 16, %s468_s2, [#allocation9]  }
  0xfc   :  { %401 = dma.done.wait [#allocation6], 16  }
  0xfd   :  { %402 = vsyncadd [#allocation6], 4294967280 }
  0xfe   :  { %403 = dma.done.wait [#allocation9], 16  }
  0xff   :  { %404 = vsyncadd [#allocation9], 4294967280 }
 0x100   :  { %329 = vsyncpa [#allocation5], 1 }
 0x101   :  { %330 = vsyncpa [#allocation6], 1 }
 0x102   :  { %331 = vsyncpa [#allocation9], 1 }

</bundles_post_ra>
